<compile_context>
chip_gen: v7x
topology: tpu7x:2x2x1
jax: 0.10.0
libtpu: 0.0.40
codegen_flags: <defaults>
</compile_context>

<pallas_src>
import math

import jax
import jax.numpy as jnp
from jax.experimental import pallas as pl
from jax.experimental.pallas import tpu as pltpu


def make_attention_kernel(num_heads: int, bb: int, N: int, C: int,
                          mxu_dtype=jnp.bfloat16):
    nh = num_heads
    hd = C // nh
    T = bb * N          # tokens handled per grid step (the lane axis everywhere)

    def attn_kernel(x_ref, wqkv_ref, wp_ref, b_ref, o_ref, qkv_sc, out_sc):
        # x_ref:    (1, C, T)      transposed tokens (channel sublanes, token lanes), bf16
        # wqkv_ref: (3C, C)        W_qkv^T, rows head-major (nh, [q|k|v], hd), Q pre-scaled, bf16
        # wp_ref:   (C, C)         W_proj^T, bf16
        # b_ref:    (C, 1)         proj bias, f32
        # o_ref:    (1, C, T)      transposed output block (lane-dense token axis), f32
        # qkv_sc:   (nh, 3*hd, T)  f32 scratch: per-head stacked [q; k; v] rows
        # out_sc:   (nh, hd, T)    f32 scratch: per-head attention output (transposed)
        x = x_ref[0]                                               # (C, T) bf16

        # ---- QKV projection: one lane-dense 2-D matmul (output lanes = T).
        # Rows come out head-major because the wrapper pre-permuted the weight
        # rows, so the reshape below is a free sublane-major regrouping.
        qkv = jnp.dot(wqkv_ref[...], x,
                      preferred_element_type=jnp.float32)          # (3C, T) f32
        qkv_sc[...] = qkv.reshape(nh, 3 * hd, T)

        # ---- per-head attention: the loop bounds the live range of the (N, N)
        # score / exp tiles to one head (x bb) at a time.
        @pl.loop(0, nh)
        def _per_head(h):
            slab = qkv_sc[h]                                       # (3hd, T) f32
            for b in range(bb):                                    # static, bb is small
                sl = slice(b * N, (b + 1) * N)
                qb = slab[0 * hd:1 * hd, sl].astype(mxu_dtype)     # (hd, N)
                kb = slab[1 * hd:2 * hd, sl].astype(mxu_dtype)     # (hd, N)
                vb = slab[2 * hd:3 * hd, sl].astype(mxu_dtype)     # (hd, N)
                # Scores oriented (k, q): softmax reduces over sublanes and the
                # denominator is lane-aligned with the (hd, N) PV output.
                s = jnp.einsum('dk,dq->kq', kb, qb,
                               preferred_element_type=jnp.float32)  # (N, N) f32
                m = jnp.max(s, axis=0, keepdims=True)                # (1, N)
                e = jnp.exp(s - m)                                   # (N, N) f32
                denom = jnp.sum(e, axis=0, keepdims=True)            # (1, N)
                # PV on the unnormalized weights; normalize the (hd, N) result
                # afterwards (8x fewer multiplies than normalizing e).
                oT = jnp.einsum('dk,kq->dq', vb, e.astype(mxu_dtype),
                                preferred_element_type=jnp.float32)  # (hd, N)
                oT = oT * pl.reciprocal(denom, approx=True)          # EUP vrcp
                out_sc[h, :, sl] = oT

        # ---- output projection: one (C, C) x (C, T) matmul (contraction C,
        # not hd) + bias; lane-dense (C, T) store.
        outT = out_sc[...].reshape(C, T).astype(mxu_dtype)           # (C, T)
        yT = jnp.dot(wp_ref[...], outT,
                     preferred_element_type=jnp.float32)             # (C, T) f32
        o_ref[0] = (yT + b_ref[...]).astype(o_ref.dtype)

    return attn_kernel


def _pick_batch_fold(B: int, N: int, C: int, vmem_budget_bytes: int = 8 << 20) -> int:
    """Largest divisor bb of B such that bb*N reaches ~128 lanes, VMEM-bounded.

    Keeps the token lane axis of every operand / store >= 128 wide when the
    batch allows it (dense vst), without hardcoding a per-generation VMEM size
    (v7x: 64 MiB physical / 32 MiB scoped default vs 128 MiB on v5e/v6e).
    """
    target = max(1, -(-128 // N))            # ceil(128 / N)

    def step_vmem_bytes(bb):
        T = bb * N
        x_blk = 2 * C * T * 2                # bf16 input block, double-buffered
        o_blk = 2 * C * T * 4                # f32 output block, double-buffered
        scratch = (3 * C + C) * T * 4        # qkv + attn-out f32 scratches
        weights = (3 * C * C + C * C) * 2 + C * 4
        return x_blk + o_blk + scratch + weights

    best = 1
    for bb in range(1, B + 1):
        if bb > target:
            break
        if B % bb:
            continue
        if step_vmem_bytes(bb) > vmem_budget_bytes:
            break
        best = bb
    return best


def attention_pallas(x_nchw, w_qkv, w_proj, b_proj, num_heads):
    """x_nchw: (B, C, H, W) f32; w_qkv: (C, 3C), w_proj: (C, C) stored (in, out);
    b_proj: (C,).  Returns (B, C, H, W) f32 (forward / eval mode)."""
    B, C, H, W = x_nchw.shape
    N = H * W
    nh = num_heads
    hd = C // nh
    scale = hd ** (-0.5)

    # ---- one-time weight preprocessing (outside the kernel) ----
    # (C, 3C) columns ordered (3, nh, hd)  ->  W^T rows ordered (nh, 3, hd), so
    # qkv^T = Wt @ x^T comes out head-major and per-head q/k/v are contiguous
    # sublane row blocks.  The softmax scale is folded into the Q rows.
    w3 = w_qkv.reshape(C, 3, nh, hd)
    w3 = w3.at[:, 0].multiply(scale)
    wqkvT = jnp.transpose(w3, (2, 1, 3, 0)).reshape(3 * C, C).astype(jnp.bfloat16)
    wpT = w_proj.T.astype(jnp.bfloat16)                  # y^T = Wp^T @ out^T
    b_col = b_proj.reshape(C, 1).astype(jnp.float32)

    # ---- batch folding: token lane axis >= 128 per grid step when possible ----
    bb = _pick_batch_fold(B, N, C)
    grid_b = B // bb
    T = bb * N

    # n c h w -> (group) c (bb*(h w)) : channel sublanes, token lanes, bf16.
    x_t = (x_nchw.reshape(grid_b, bb, C, N)
           .transpose(0, 2, 1, 3)
           .reshape(grid_b, C, T)
           .astype(jnp.bfloat16))

    kernel = make_attention_kernel(nh, bb, N, C)

    out_t = pl.pallas_call(
        kernel,
        out_shape=jax.ShapeDtypeStruct((grid_b, C, T), jnp.float32),
        grid_spec=pltpu.PrefetchScalarGridSpec(
            num_scalar_prefetch=0,
            grid=(grid_b,),
            in_specs=[
                pl.BlockSpec((1, C, T), lambda g: (g, 0, 0)),
                # Constant-index weight blocks: never re-fetched across steps.
                pl.BlockSpec((3 * C, C), lambda g: (0, 0)),
                pl.BlockSpec((C, C), lambda g: (0, 0)),
                pl.BlockSpec((C, 1), lambda g: (0, 0)),
            ],
            out_specs=pl.BlockSpec((1, C, T), lambda g: (g, 0, 0)),
            scratch_shapes=[
                pltpu.VMEM((nh, 3 * hd, T), jnp.float32),   # per-head q/k/v rows
                pltpu.VMEM((nh, hd, T), jnp.float32),       # per-head attn output
            ],
        ),
        compiler_params=pltpu.CompilerParams(
            # Batch groups are independent -> megacore-shardable on dual-TC
            # chips; with grid_b == 1 everything stays folded on one core.
            dimension_semantics=("parallel",)),
    )(x_t, wqkvT, wpT, b_col)

    # (grid_b, C, bb*N) -> (B, C, H, W)
    return (out_t.reshape(grid_b, C, bb, N)
            .transpose(0, 2, 1, 3)
            .reshape(B, C, H, W))


def attention_reference(x_nchw, w_qkv, w_proj, b_proj, num_heads):
    """Pure-JAX f32 reference mirroring the PyTorch forward."""
    B, C, H, W = x_nchw.shape
    N = H * W
    hd = C // num_heads
    scale = hd ** (-0.5)
    x = jnp.transpose(x_nchw, (0, 2, 3, 1)).reshape(B, N, C)
    qkv = x @ w_qkv                                                 # (B, N, 3C)
    qkv = qkv.reshape(B, N, 3, num_heads, hd).transpose(2, 0, 3, 1, 4)
    q, k, v = qkv[0], qkv[1], qkv[2]                                # (B, nh, N, hd)
    attn = jnp.einsum("bhqd,bhkd->bhqk", q, k) * scale
    attn = jax.nn.softmax(attn, axis=-1)
    out = jnp.einsum("bhqk,bhkd->bhqd", attn, v)                    # (B, nh, N, hd)
    out = out.transpose(0, 2, 1, 3).reshape(B, N, C)
    out = out @ w_proj + b_proj.reshape(1, C)
    return jnp.transpose(out.reshape(B, H, W, C), (0, 3, 1, 2))


if __name__ == "__main__":
    # Small, module-consistent shapes: dim=C=32 divisible by num_heads=4.
    B, C, H, W = 2, 32, 8, 8
    num_heads = 4

    key = jax.random.PRNGKey(0)
    kx, kq, kp, kb = jax.random.split(key, 4)

    x = jax.random.normal(kx, (B, C, H, W), dtype=jnp.float32)

    # Deterministic parameter init (uniform, like PyTorch Linear default bounds).
    bound = 1.0 / math.sqrt(C)
    w_qkv = jax.random.uniform(kq, (C, 3 * C), jnp.float32, -bound, bound)
    w_proj = jax.random.uniform(kp, (C, C), jnp.float32, -bound, bound)
    b_proj = jax.random.uniform(kb, (C,), jnp.float32, -bound, bound)
    # attn_drop / proj_drop are identity in eval mode (p=0.0 default).

    out = attention_pallas(x, w_qkv, w_proj, b_proj, num_heads)
    out = jax.block_until_ready(out)

    ref = attention_reference(x, w_qkv, w_proj, b_proj, num_heads)
    assert out.shape == (B, C, H, W)
    # bf16 MXU operands + scale folded into bf16 Q weights + approx reciprocal
    # -> loosened tolerance; accumulation and softmax stay f32.
    assert jnp.allclose(out, ref, atol=2e-2, rtol=2e-2), "mismatch vs reference"

    print("KERNEL_OK")
</pallas_src>

<mosaic_0001>
module attributes {stable_mosaic.version = 11 : i64} {
  func.func @attn_kernel(%arg0: i32, %arg1: memref<1x32x128xbf16, #tpu.memory_space<vmem>>, %arg2: memref<96x32xbf16, #tpu.memory_space<vmem>>, %arg3: memref<32x32xbf16, #tpu.memory_space<vmem>>, %arg4: memref<32x1xf32, #tpu.memory_space<vmem>>, %arg5: memref<1x32x128xf32, #tpu.memory_space<vmem>>, %arg6: memref<4x24x128xf32, #tpu.memory_space<vmem>>, %arg7: memref<4x8x128xf32, #tpu.memory_space<vmem>>) attributes {dimension_semantics = [#tpu.dimension_semantics<parallel>], iteration_bounds = array<i64: 1>, scalar_prefetch = 0 : i64, scratch_operands = 2 : i64, tpu.core_type = #tpu.core_type<tc>, window_params = [{transform_indices = @transform_0, window_bounds = array<i64: 1, 32, 128>}, {pipeline_mode = #tpu.pipeline_mode<synchronous>, transform_indices = @transform_1, window_bounds = array<i64: 96, 32>}, {pipeline_mode = #tpu.pipeline_mode<synchronous>, transform_indices = @transform_2, window_bounds = array<i64: 32, 32>}, {pipeline_mode = #tpu.pipeline_mode<synchronous>, transform_indices = @transform_3, window_bounds = array<i64: 32, 1>}, {transform_indices = @transform_4, window_bounds = array<i64: 1, 32, 128>}]} {
    %c0 = arith.constant 0 : index
    %c0_0 = arith.constant 0 : index
    %c0_1 = arith.constant 0 : index
    %0 = vector.load %arg1[%c0, %c0_0, %c0_1] : memref<1x32x128xbf16, #tpu.memory_space<vmem>>, vector<1x32x128xbf16>
    %1 = vector.shape_cast %0 : vector<1x32x128xbf16> to vector<32x128xbf16>
    %c0_2 = arith.constant 0 : index
    %c0_3 = arith.constant 0 : index
    %2 = vector.load %arg2[%c0_2, %c0_3] : memref<96x32xbf16, #tpu.memory_space<vmem>>, vector<96x32xbf16>
    %cst = arith.constant dense<0.000000e+00> : vector<96x128xf32>
    %3 = tpu.matmul %2, %1, %cst {dimension_numbers = #tpu.dot_dimension_numbers<[1], [0], [0], [1], [0, 0, 1, 1], [], []>} : vector<96x32xbf16>, vector<32x128xbf16>, vector<96x128xf32> -> vector<96x128xf32>
    %4 = vector.shape_cast %3 : vector<96x128xf32> to vector<4x24x128xf32>
    %c0_4 = arith.constant 0 : index
    %c0_5 = arith.constant 0 : index
    %c0_6 = arith.constant 0 : index
    %5 = vector.load %arg6[%c0_4, %c0_5, %c0_6] : memref<4x24x128xf32, #tpu.memory_space<vmem>>, vector<4x24x128xf32>
    tpu.vector_store %arg6[%c0_4, %c0_5, %c0_6], %4 {strides = array<i32>} : memref<4x24x128xf32, #tpu.memory_space<vmem>>, vector<4x24x128xf32>,
    %c0_i32 = arith.constant 0 : i32
    %c4_i32 = arith.constant 4 : i32
    %6 = arith.addi %c0_i32, %c4_i32 : i32
    %c1_i32 = arith.constant 1 : i32
    scf.for %arg8 = %c0_i32 to %6 step %c1_i32  : i32 {
      %c1_i32_19 = arith.constant 1 : i32
      %18 = arith.muli %arg8, %c1_i32_19 : i32
      %c0_i32_20 = arith.constant 0 : i32
      %19 = arith.addi %c0_i32_20, %18 : i32
      %20 = arith.index_cast %19 : i32 to index
      %c0_21 = arith.constant 0 : index
      %c0_22 = arith.constant 0 : index
      %21 = vector.load %arg6[%20, %c0_21, %c0_22] : memref<4x24x128xf32, #tpu.memory_space<vmem>>, vector<1x24x128xf32>
      %22 = vector.shape_cast %21 : vector<1x24x128xf32> to vector<24x128xf32>
      %23 = vector.extract_strided_slice %22 {offsets = [0, 0], sizes = [8, 64], strides = [1, 1]} : vector<24x128xf32> to vector<8x64xf32>
      %24 = arith.truncf %23 : vector<8x64xf32> to vector<8x64xbf16>
      %25 = vector.extract_strided_slice %22 {offsets = [8, 0], sizes = [8, 64], strides = [1, 1]} : vector<24x128xf32> to vector<8x64xf32>
      %26 = arith.truncf %25 : vector<8x64xf32> to vector<8x64xbf16>
      %27 = vector.extract_strided_slice %22 {offsets = [16, 0], sizes = [8, 64], strides = [1, 1]} : vector<24x128xf32> to vector<8x64xf32>
      %28 = arith.truncf %27 : vector<8x64xf32> to vector<8x64xbf16>
      "tpu.trace_start"() <{level = 10 : i32, message = "dk,dq->kq"}> : () -> ()
      %cst_23 = arith.constant dense<0.000000e+00> : vector<64x64xf32>
      %29 = tpu.matmul %26, %24, %cst_23 {dimension_numbers = #tpu.dot_dimension_numbers<[0], [0], [1], [1], [0, 1, 1, 1], [], []>} : vector<8x64xbf16>, vector<8x64xbf16>, vector<64x64xf32> -> vector<64x64xf32>
      "tpu.trace_stop"() : () -> ()
      %cst_24 = arith.constant dense<0xFF800000> : vector<64xf32>
      %30 = vector.multi_reduction <maximumf>, %29, %cst_24 [0] : vector<64x64xf32> to vector<64xf32>
      %31 = vector.shape_cast %30 : vector<64xf32> to vector<1x64xf32>
      %32 = vector.broadcast %31 : vector<1x64xf32> to vector<64x64xf32>
      %33 = arith.subf %29, %32 : vector<64x64xf32>
      %34 = math.exp %33 : vector<64x64xf32>
      %cst_25 = arith.constant dense<0.000000e+00> : vector<64xf32>
      %35 = vector.multi_reduction <add>, %34, %cst_25 [0] : vector<64x64xf32> to vector<64xf32>
      %36 = vector.shape_cast %35 : vector<64xf32> to vector<1x64xf32>
      %37 = arith.truncf %34 : vector<64x64xf32> to vector<64x64xbf16>
      "tpu.trace_start"() <{level = 10 : i32, message = "dk,kq->dq"}> : () -> ()
      %cst_26 = arith.constant dense<0.000000e+00> : vector<8x64xf32>
      %38 = tpu.matmul %28, %37, %cst_26 {dimension_numbers = #tpu.dot_dimension_numbers<[1], [0], [0], [1], [0, 0, 1, 1], [], []>} : vector<8x64xbf16>, vector<64x64xbf16>, vector<8x64xf32> -> vector<8x64xf32>
      "tpu.trace_stop"() : () -> ()
      %39 = tpu.reciprocal %36 {approx = true} : vector<1x64xf32> -> vector<1x64xf32>
      %40 = vector.broadcast %39 : vector<1x64xf32> to vector<8x64xf32>
      %41 = arith.mulf %38, %40 : vector<8x64xf32>
      %42 = arith.index_cast %19 : i32 to index
      %c0_27 = arith.constant 0 : index
      %c0_28 = arith.constant 0 : index
      %43 = vector.load %arg7[%42, %c0_27, %c0_28] : memref<4x8x128xf32, #tpu.memory_space<vmem>>, vector<1x8x64xf32>
      %44 = vector.shape_cast %43 : vector<1x8x64xf32> to vector<8x64xf32>
      %45 = vector.shape_cast %41 : vector<8x64xf32> to vector<1x8x64xf32>
      tpu.vector_store %arg7[%42, %c0_27, %c0_28], %45 {strides = array<i32>} : memref<4x8x128xf32, #tpu.memory_space<vmem>>, vector<1x8x64xf32>,
      %46 = vector.extract_strided_slice %22 {offsets = [0, 64], sizes = [8, 64], strides = [1, 1]} : vector<24x128xf32> to vector<8x64xf32>
      %47 = arith.truncf %46 : vector<8x64xf32> to vector<8x64xbf16>
      %48 = vector.extract_strided_slice %22 {offsets = [8, 64], sizes = [8, 64], strides = [1, 1]} : vector<24x128xf32> to vector<8x64xf32>
      %49 = arith.truncf %48 : vector<8x64xf32> to vector<8x64xbf16>
      %50 = vector.extract_strided_slice %22 {offsets = [16, 64], sizes = [8, 64], strides = [1, 1]} : vector<24x128xf32> to vector<8x64xf32>
      %51 = arith.truncf %50 : vector<8x64xf32> to vector<8x64xbf16>
      "tpu.trace_start"() <{level = 10 : i32, message = "dk,dq->kq"}> : () -> ()
      %cst_29 = arith.constant dense<0.000000e+00> : vector<64x64xf32>
      %52 = tpu.matmul %49, %47, %cst_29 {dimension_numbers = #tpu.dot_dimension_numbers<[0], [0], [1], [1], [0, 1, 1, 1], [], []>} : vector<8x64xbf16>, vector<8x64xbf16>, vector<64x64xf32> -> vector<64x64xf32>
      "tpu.trace_stop"() : () -> ()
      %cst_30 = arith.constant dense<0xFF800000> : vector<64xf32>
      %53 = vector.multi_reduction <maximumf>, %52, %cst_30 [0] : vector<64x64xf32> to vector<64xf32>
      %54 = vector.shape_cast %53 : vector<64xf32> to vector<1x64xf32>
      %55 = vector.broadcast %54 : vector<1x64xf32> to vector<64x64xf32>
      %56 = arith.subf %52, %55 : vector<64x64xf32>
      %57 = math.exp %56 : vector<64x64xf32>
      %cst_31 = arith.constant dense<0.000000e+00> : vector<64xf32>
      %58 = vector.multi_reduction <add>, %57, %cst_31 [0] : vector<64x64xf32> to vector<64xf32>
      %59 = vector.shape_cast %58 : vector<64xf32> to vector<1x64xf32>
      %60 = arith.truncf %57 : vector<64x64xf32> to vector<64x64xbf16>
      "tpu.trace_start"() <{level = 10 : i32, message = "dk,kq->dq"}> : () -> ()
      %cst_32 = arith.constant dense<0.000000e+00> : vector<8x64xf32>
      %61 = tpu.matmul %51, %60, %cst_32 {dimension_numbers = #tpu.dot_dimension_numbers<[1], [0], [0], [1], [0, 0, 1, 1], [], []>} : vector<8x64xbf16>, vector<64x64xbf16>, vector<8x64xf32> -> vector<8x64xf32>
      "tpu.trace_stop"() : () -> ()
      %62 = tpu.reciprocal %59 {approx = true} : vector<1x64xf32> -> vector<1x64xf32>
      %63 = vector.broadcast %62 : vector<1x64xf32> to vector<8x64xf32>
      %64 = arith.mulf %61, %63 : vector<8x64xf32>
      %65 = arith.index_cast %19 : i32 to index
      %c0_33 = arith.constant 0 : index
      %c64 = arith.constant 64 : index
      %66 = vector.load %arg7[%65, %c0_33, %c64] : memref<4x8x128xf32, #tpu.memory_space<vmem>>, vector<1x8x64xf32>
      %67 = vector.shape_cast %66 : vector<1x8x64xf32> to vector<8x64xf32>
      %68 = vector.shape_cast %64 : vector<8x64xf32> to vector<1x8x64xf32>
      tpu.vector_store %arg7[%65, %c0_33, %c64], %68 {strides = array<i32>} : memref<4x8x128xf32, #tpu.memory_space<vmem>>, vector<1x8x64xf32>,
    }
    %c4_i32_7 = arith.constant 4 : i32
    %c0_8 = arith.constant 0 : index
    %c0_9 = arith.constant 0 : index
    %c0_10 = arith.constant 0 : index
    %7 = vector.load %arg7[%c0_8, %c0_9, %c0_10] : memref<4x8x128xf32, #tpu.memory_space<vmem>>, vector<4x8x128xf32>
    %8 = vector.shape_cast %7 : vector<4x8x128xf32> to vector<32x128xf32>
    %9 = arith.truncf %8 : vector<32x128xf32> to vector<32x128xbf16>
    %c0_11 = arith.constant 0 : index
    %c0_12 = arith.constant 0 : index
    %10 = vector.load %arg3[%c0_11, %c0_12] : memref<32x32xbf16, #tpu.memory_space<vmem>>, vector<32x32xbf16>
    %cst_13 = arith.constant dense<0.000000e+00> : vector<32x128xf32>
    %11 = tpu.matmul %10, %9, %cst_13 {dimension_numbers = #tpu.dot_dimension_numbers<[1], [0], [0], [1], [0, 0, 1, 1], [], []>} : vector<32x32xbf16>, vector<32x128xbf16>, vector<32x128xf32> -> vector<32x128xf32>
    %c0_14 = arith.constant 0 : index
    %c0_15 = arith.constant 0 : index
    %12 = vector.load %arg4[%c0_14, %c0_15] : memref<32x1xf32, #tpu.memory_space<vmem>>, vector<32x1xf32>
    %13 = vector.broadcast %12 : vector<32x1xf32> to vector<32x128xf32>
    %14 = arith.addf %11, %13 : vector<32x128xf32>
    %c0_16 = arith.constant 0 : index
    %c0_17 = arith.constant 0 : index
    %c0_18 = arith.constant 0 : index
    %15 = vector.load %arg5[%c0_16, %c0_17, %c0_18] : memref<1x32x128xf32, #tpu.memory_space<vmem>>, vector<1x32x128xf32>
    %16 = vector.shape_cast %15 : vector<1x32x128xf32> to vector<32x128xf32>
    %17 = vector.shape_cast %14 : vector<32x128xf32> to vector<1x32x128xf32>
    tpu.vector_store %arg5[%c0_16, %c0_17, %c0_18], %17 {strides = array<i32>} : memref<1x32x128xf32, #tpu.memory_space<vmem>>, vector<1x32x128xf32>,
    return
  }
  func.func @transform_0(%arg0: i32) -> (i32, i32, i32) {
    %c0_i32 = arith.constant 0 : i32
    %c0_i32_0 = arith.constant 0 : i32
    %c0_i32_1 = arith.constant 0 : i32
    return %arg0, %c0_i32, %c0_i32_0 : i32, i32, i32
  }
  func.func @transform_1(%arg0: i32) -> (i32, i32) {
    %c0_i32 = arith.constant 0 : i32
    %c0_i32_0 = arith.constant 0 : i32
    %c0_i32_1 = arith.constant 0 : i32
    return %c0_i32, %c0_i32_0 : i32, i32
  }
  func.func @transform_2(%arg0: i32) -> (i32, i32) {
    %c0_i32 = arith.constant 0 : i32
    %c0_i32_0 = arith.constant 0 : i32
    %c0_i32_1 = arith.constant 0 : i32
    return %c0_i32, %c0_i32_0 : i32, i32
  }
  func.func @transform_3(%arg0: i32) -> (i32, i32) {
    %c0_i32 = arith.constant 0 : i32
    %c0_i32_0 = arith.constant 0 : i32
    %c0_i32_1 = arith.constant 0 : i32
    return %c0_i32, %c0_i32_0 : i32, i32
  }
  func.func @transform_4(%arg0: i32) -> (i32, i32, i32) {
    %c0_i32 = arith.constant 0 : i32
    %c0_i32_0 = arith.constant 0 : i32
    %c0_i32_1 = arith.constant 0 : i32
    return %arg0, %c0_i32, %c0_i32_0 : i32, i32, i32
  }
}

</mosaic_0001>

<bundles_post_ra>
// kernel: tpu_custom_call.1
= control target key start
LH: loop header
LB: loop body
LE: loop exit
PB: predicated region body
PF: predicated region fallthrough
CT: control target
= control target key end

     0   :  { %vm77_vm0 = vcmask 261120   ;;  %s1186_s0 = inlined_call_operand.vmem [shape: bf16[1,32,128], index: 0, kind: input, shape index: {}]   ;;  %s1187_s1 = inlined_call_operand.vmem [shape: bf16[96,32], index: 1, kind: input, shape index: {}]   ;;  %s1188_s2 = inlined_call_operand.vmem [shape: bf16[32,32], index: 2, kind: input, shape index: {}]   ;;  %s1189_s3 = inlined_call_operand.vmem [shape: f32[32,1], index: 3, kind: input, shape index: {}]   ;;  %s1190_s4 = inlined_call_operand.hbm [shape: f32[1,32,128], index: 4, kind: output, shape index: {}]  }
   0x1   :  { %v926_v0 = vld [vmem:[%s1186_s0] sm:$0xff]   ;;  %v927_v1 = vld [vmem:[%s1186_s0 + $0x8] sm:$0xff]  }
   0x2   :  { %904 = vmatprep.subr.bf16.mxu1 %v926_v0 }
   0x3   :  { %9 = vsyncpa [#allocation5], 0  ;;  %836 = vmatprep.subr.bf16.mxu0 %v926_v0  ;;  %906 = vmatpush3.bf16.msra.mxu1 %v926_v0  ;;  %v928_v2 = vld [vmem:[%s1187_s1 + $0x10] sm:$0xff]   ;;  %v929_v3 = vld [vmem:[%s1187_s1 + $0x18] sm:$0xff]  }
   0x4   :  { %837 = vmatpush3.bf16.msra.mxu0 %v926_v0  ;;  %905 = vmatprep.subr.bf16.mxu1 %v927_v1  ;;  %v930_v4 = vld [vmem:[%s1187_s1] sm:$0xff]   ;;  %v931_v5 = vld [vmem:[%s1187_s1 + $0x8] sm:$0xff]  }
   0x5   :  { %838 = vmatprep.subr.bf16.mxu0 %v927_v1  ;;  %844 = vmatprep.mubr.msk.bf16.mxu1 %vm77_vm0, %v928_v2  ;;  %v932_v6 = vld [vmem:[%s1187_s1 + $0x20] sm:$0xff]   ;;  %v933_v7 = vld [vmem:[%s1187_s1 + $0x28] sm:$0xff]   ;;  %s1068_s1 = smov 0  }
   0x6   :  { %840 = vmatprep.mubr.msk.bf16.mxu0 %vm77_vm0, %v930_v4 }
   0x7   :  { %907 = vmatpush3.bf16.msra.mxu1 %v927_v1 }
   0x8   :  { %839 = vmatpush3.bf16.msra.mxu0 %v927_v1 }
   0xa   :  { %845 = vmatmul.mubr.msk.bf16.vlgmr.msra.gmra.mrb[0].mxu1 %vm77_vm0, %v929_v3 }
   0xb   :  { %841 = vmatmul.mubr.msk.bf16.vlgmr.msra.gmra.mrb[0].mxu0 %vm77_vm0, %v931_v5  ;;  %848 = vmatprep.mubr.msk.bf16.mxu1 %vm77_vm0, %v932_v6 }
  0x12   :  { %849 = vmatmul.mubr.msk.bf16.gmra.mrb[4].mxu1 %vm77_vm0, %v933_v7 }
  0xdd   :  { %v846_v8 = vpop.f32.mrb[0].mxu1 }
  0xde   :  { %v842_v9 = vpop.f32.mrb[0].mxu0  ;;  %183 = vst [vmem:[#allocation2 + $0x30] sm:$0xff] %v846_v8  ;;  %v146_v10 = vpop.f32.mrb[1].mxu1 }
  0xdf   :  { %179 = vst [vmem:[#allocation2 + $0x10] sm:$0xff] %v842_v9  ;;  %v130_v11 = vpop.f32.mrb[1].mxu0  ;;  %181 = vst [vmem:[#allocation2 + $0x20] sm:$0xff] %v146_v10  ;;  %v847_v12 = vpop.f32.mrb[2].mxu1 }
  0xe0   :  { %177 = vst [vmem:[#allocation2] sm:$0xff] %v130_v11  ;;  %v843_v13 = vpop.f32.mrb[2].mxu0  ;;  %184 = vst [vmem:[#allocation2 + $0x38] sm:$0xff] %v847_v12  ;;  %v149_v14 = vpop.f32.mrb[3].mxu1 }
  0xe1   :  { %180 = vst [vmem:[#allocation2 + $0x18] sm:$0xff] %v843_v13  ;;  %v133_v15 = vpop.f32.mrb[3].mxu0  ;;  %182 = vst [vmem:[#allocation2 + $0x28] sm:$0xff] %v149_v14 }
  0xe2   :  { %178 = vst [vmem:[#allocation2 + $0x8] sm:$0xff] %v133_v15 }
  0xe5   :  { %v850_v16 = vpop.f32.mrb[4].mxu1 }
  0xe6   :  { %187 = vst [vmem:[#allocation2 + $0x50] sm:$0xff] %v850_v16  ;;  %v162_v17 = vpop.f32.mrb[5].mxu1 }
  0xe7   :  { %185 = vst [vmem:[#allocation2 + $0x40] sm:$0xff] %v162_v17  ;;  %v851_v18 = vpop.f32.mrb[6].mxu1 }
  0xe8   :  { %188 = vst [vmem:[#allocation2 + $0x58] sm:$0xff] %v851_v18  ;;  %v165_v19 = vpop.f32.mrb[7].mxu1 }
  0xe9   :  { %186 = vst [vmem:[#allocation2 + $0x48] sm:$0xff] %v165_v19 }
  0xea LB: > { %s195_s30 = smul.u32 24, %s1004_s1  ;;  %vm232_vm1 = vcmask 1043456   ;;  %s1006_s6 = smov 64   ;;  %vm219_vm2 = vcmask 64512   ;;  %v1007_v36 = vmov 0.0   ;;  %vm1008_vm3 = vmmov 0   ;;  %s1004_s1 = sphi %s1068_s1, %s194_s1  }
  0xeb   : > { %862 = vmatprep.subr.bf16.mxu1 %v1007_v36  ;;  %870 = vmatprep.mubr.msk.bf16.mxu1 %vm1008_vm3, %v1007_v36  ;;  %vm301_vm4 = vcmask 523264   ;;  %s794_s7 = sshll.u32 %s1004_s1, 3  ;;  %vm645_vm5 = vcmask 1048064   ;;  %s194_s1 = sadd.s32 1, %s1004_s1  }
  0xec   : > { %s1074_s5 = scalar_lea.vmem [#allocation2], %s195_s30  ;;  %s418_s8 = scalar_lea.vmem [#allocation3], %s794_s7 }
  0xed   : > { %p191_p0 = scmp.ge.s32.totalorder %s194_s1, 4  }
  0xee   :  { %s1010_s21 = smov (%p191_p0), [#allocation4]  }
  0xef   :  { %s755_s22 = sshll.u32 (%p191_p0), %s1010_s21, 4  ;;  %s756_s22 = int_to_ptr.vmem [resolvable:$true] %s755_s22 }
  0xf0   : > { %v198_v20 = vld [vmem:[%s1074_s5 + $0x8] sm:$0xff]  ;;  %v197_v21 = vld [vmem:[%s1074_s5] sm:$0xff]  ;;  %v199_v37 = vld [vmem:[%s1074_s5 + $0x10] sm:$0xff]  ;;  %p979_p2 = scmp.lt.s32.totalorder (%p191_p0), %s756_s22, %s756_s22 }
  0xf1   : > { %v201_v22 = vpack.c.bf16 %v198_v20, %v198_v20  ;;  %v200_v23 = vpack.c.bf16 %v197_v21, %v197_v21  ;;  %v1096_v38 = vpack.c.bf16 %v199_v37, %v199_v37 }
  0xf3   : > { %203 = vxpose.xlu1.c.b16.start.end [1/1] (short) (narrow) %v201_v22, 64  ;;  %421 = vrot.lane.b32.xlu0 %v201_v22, %s1006_s6  ;;  %v234_v24 = vsel %vm232_vm1, %v200_v23, 0 }
  0xf4   : > { %908 = vmatprep.subr.msk.bf16.mxu0 %vm232_vm1, %v200_v23 }
  0xf5   : > { %853 = vmatpush3.bf16.msra.mxu0 %v234_v24 }
  0xf7   : > { %441 = vrot.lane.b32.xlu0 %v200_v23, %s1006_s6 }
  0xfb   : > { %594 = vrot.lane.b32.xlu0 %v1096_v38, %s1006_s6 }
 0x159   : > { %v211_v25 = vpop.trf.xlu1 }
 0x15a   : > { %854 = vmatprep.mubr.msk.bf16.mxu0 %vm219_vm2, %v211_v25 }
 0x15d   : > { %v212_v26 = vpop.trf.xlu1 }
 0x15e   : > { %855 = vmatmul.mubr.msk.bf16.vlgmr.msra.gmra.mrb[0].mxu0 %vm219_vm2, %v212_v26 }
 0x161   : > { %v213_v27 = vpop.trf.xlu1 }
 0x162   : > { %858 = vmatprep.mubr.msk.bf16.mxu0 %vm219_vm2, %v213_v27 }
 0x165   : > { %v214_v28 = vpop.trf.xlu1  ;;  %v422_v29 = vpop.permute.xlu0 %421 }
 0x166   : > { %424 = vxpose.xlu1.c.b16.start.end [1/1] (short) (narrow) %v422_v29, 64  ;;  %859 = vmatmul.mubr.msk.bf16.gmra.mrb[4].mxu0 %vm219_vm2, %v214_v28 }
 0x169   : > { %v442_v30 = vpop.permute.xlu0 %441 }
 0x16a   : > { %v456_v31 = vsel %vm232_vm1, %v442_v30, 0  ;;  %909 = vmatprep.subr.msk.bf16.mxu0 %vm232_vm1, %v442_v30 }
 0x16b   : > { %875 = vmatpush3.bf16.msra.mxu0 %v456_v31 }
 0x1cc   : > { %v432_v32 = vpop.trf.xlu1 }
 0x1cd   : > { %876 = vmatprep.mubr.msk.bf16.mxu0 %vm219_vm2, %v432_v32 }
 0x1d0   : > { %v433_v33 = vpop.trf.xlu1 }
 0x1d1   : > { %877 = vmatmul.mubr.msk.bf16.vlgmr.msra.gmra.mrb[8].mxu0 %vm219_vm2, %v433_v33 }
 0x1d4   : > { %v434_v34 = vpop.trf.xlu1 }
 0x1d5   : > { %880 = vmatprep.mubr.msk.bf16.mxu0 %vm219_vm2, %v434_v34 }
 0x1d8   : > { %v435_v35 = vpop.trf.xlu1 }
 0x1d9   : > { %881 = vmatmul.mubr.msk.bf16.gmra.mrb[12].mxu0 %vm219_vm2, %v435_v35 }
 0x231   : > { %v856_v39 = vpop.f32.mrb[0].mxu0 }
 0x232   : > { %v270_v40 = vpop.f32.mrb[1].mxu0  ;;  %v304_v43 = vsel %vm301_vm4, %v856_v39, -inf }
 0x233   : > { %v857_v41 = vpop.f32.mrb[2].mxu0  ;;  %v302_v44 = vsel %vm301_vm4, %v270_v40, -inf }
 0x234   : > { %v273_v42 = vpop.f32.mrb[3].mxu0  ;;  %v305_v46 = vsel %vm301_vm4, %v857_v41, -inf }
 0x235   : > { %v303_v49 = vsel %vm301_vm4, %v273_v42, -inf }
 0x239   : > { %v860_v45 = vpop.f32.mrb[4].mxu0 }
 0x23a   : > { %v310_v47 = vsel %vm301_vm4, %v860_v45, -inf  ;;  %v286_v48 = vpop.f32.mrb[5].mxu0 }
 0x23b   : > { %v311_v50 = vmax.f32 %v304_v43, %v310_v47  ;;  %v306_v51 = vsel %vm301_vm4, %v286_v48, -inf  ;;  %v861_v52 = vpop.f32.mrb[6].mxu0 }
 0x23c   : > { %v307_v53 = vmax.f32 %v302_v44, %v306_v51  ;;  %v312_v54 = vsel %vm301_vm4, %v861_v52, -inf  ;;  %v289_v55 = vpop.f32.mrb[7].mxu0 }
 0x23d   : > { %v313_v56 = vmax.f32 %v305_v46, %v312_v54  ;;  %v308_v57 = vsel %vm301_vm4, %v289_v55, -inf }
 0x23e   : > { %v309_v58 = vmax.f32 %v303_v49, %v308_v57 }
 0x23f   : > { %v315_v59 = vmax.f32 %v311_v50, %v313_v56 }
 0x240   : > { %v314_v60 = vmax.f32 %v307_v53, %v309_v58 }
 0x242   : > { %v316_v61 = vmax.f32 %v314_v60, %v315_v59 }
 0x244   : > { %v317_v62 = vrot.slane %v316_v61, 4 }
 0x246   : > { %v318_v63 = vmax.f32 %v316_v61, %v317_v62 }
 0x248   : > { %v319_v0 = vrot.slane %v318_v63, 2 }
 0x24a   : > { %v320_v1 = vmax.f32 %v318_v63, %v319_v0 }
 0x24c   : > { %v321_v2 = vrot.slane %v320_v1, 1 }
 0x24e   : > { %v322_v3 = vmax.f32 %v320_v1, %v321_v2 }
 0x250   : > { %v328_v4 = vsub.f32 %v289_v55, %v322_v3  ;;  %v323_v5 = vsub.f32 %v270_v40, %v322_v3  ;;  %v324_v6 = vsub.f32 %v273_v42, %v322_v3  ;;  %v325_v7 = vsub.f32 %v856_v39, %v322_v3 }
 0x251   : > { %v326_v8 = vsub.f32 %v857_v41, %v322_v3  ;;  %v327_v9 = vsub.f32 %v286_v48, %v322_v3  ;;  %v329_v10 = vsub.f32 %v860_v45, %v322_v3  ;;  %v330_v11 = vsub.f32 %v861_v52, %v322_v3 }
 0x252   : > { %v341_v12 = vmul.f32 1.442695, %v328_v4  ;;  %v331_v13 = vmul.f32 1.442695, %v323_v5  ;;  %v333_v14 = vmul.f32 1.442695, %v324_v6 }
 0x253   : > { %v335_v15 = vmul.f32 1.442695, %v325_v7  ;;  %v337_v16 = vmul.f32 1.442695, %v326_v8  ;;  %v339_v17 = vmul.f32 1.442695, %v327_v9 }
 0x254   : > { %934 = vpow2.f32 %v341_v12  ;;  %v343_v18 = vmul.f32 1.442695, %v329_v10  ;;  %v345_v19 = vmul.f32 1.442695, %v330_v11 }
 0x255   : > { %936 = vpow2.f32 %v331_v13 }
 0x256   : > { %938 = vpow2.f32 %v333_v14 }
 0x257   : > { %940 = vpow2.f32 %v335_v15 }
 0x258   : > { %942 = vpow2.f32 %v337_v16 }
 0x259   : > { %944 = vpow2.f32 %v339_v17 }
 0x25a   : > { %946 = vpow2.f32 %v343_v18 }
 0x25b   : > { %948 = vpow2.f32 %v345_v19 }
 0x25e   : > { %v935_v20 = vpop.eup %934 }
 0x25f   : > { %v937_v21 = vpop.eup %936  ;;  %v356_v42 = vsel %vm301_vm4, %v935_v20, 0.0 }
 0x260   : > { %v939_v22 = vpop.eup %938  ;;  %v347_v23 = vsel %vm301_vm4, %v937_v21, 0.0 }
 0x261   : > { %v941_v24 = vpop.eup %940  ;;  %v348_v25 = vsel %vm301_vm4, %v939_v22, 0.0  ;;  %v368_v26 = vpack.c.bf16 %v939_v22, %v937_v21 }
 0x262   : > { %v943_v27 = vpop.eup %942  ;;  %v349_v28 = vadd.f32 %v348_v25, %v347_v23  ;;  %v350_v29 = vsel %vm301_vm4, %v941_v24, 0.0 }
 0x263   : > { %v945_v30 = vpop.eup %944  ;;  %863 = vmatpush3.bf16.msra.mxu1 %v368_v26  ;;  %v352_v31 = vsel %vm301_vm4, %v943_v27, 0.0  ;;  %v369_v32 = vpack.c.bf16 %v943_v27, %v941_v24 }
 0x264   : > { %v947_v33 = vpop.eup %946  ;;  %864 = vmatprep.subr.bf16.mxu1 %v1007_v36  ;;  %v351_v34 = vadd.f32 %v350_v29, %v349_v28  ;;  %v370_v35 = vpack.c.bf16 %v935_v20, %v945_v30  ;;  %v354_v39 = vsel %vm301_vm4, %v945_v30, 0.0 }
 0x265   : > { %v949_v37 = vpop.eup %948  ;;  %v358_v44 = vsel %vm301_vm4, %v947_v33, 0.0 }
 0x266   : > { %v371_v40 = vpack.c.bf16 %v949_v37, %v947_v33  ;;  %v353_v41 = vadd.f32 %v352_v31, %v351_v34  ;;  %v360_v46 = vsel %vm301_vm4, %v949_v37, 0.0 }
 0x267   : > { %865 = vmatpush3.bf16.msra.mxu1 %v369_v32 }
 0x268   : > { %866 = vmatprep.subr.bf16.mxu1 %v1007_v36  ;;  %v355_v43 = vadd.f32 %v354_v39, %v353_v41 }
 0x26a   : > { %v357_v45 = vadd.f32 %v356_v42, %v355_v43 }
 0x26b   : > { %867 = vmatpush3.bf16.msra.mxu1 %v370_v35 }
 0x26c   : > { %868 = vmatprep.subr.bf16.mxu1 %v1007_v36  ;;  %v359_v47 = vadd.f32 %v358_v44, %v357_v45 }
 0x26e   : > { %v1119_v48 = vadd.f32 %v360_v46, %v359_v47 }
 0x26f   : > { %869 = vmatpush3.bf16.msra.mxu1 %v371_v40 }
 0x270   : > { %884 = vmatprep.subr.bf16.mxu1 %v1007_v36 }
 0x272   : > { %871 = vmatmul.mubr.msk.bf16.vlgmr.msra.gmra.mrb[0].mxu1 %vm301_vm4, %v1096_v38 }
 0x273   : > { %892 = vmatprep.mubr.msk.bf16.mxu1 %vm1008_vm3, %v1007_v36 }
 0x2a4   : > { %v878_v49 = vpop.f32.mrb[8].mxu0 }
 0x2a5   : > { %v492_v50 = vpop.f32.mrb[9].mxu0  ;;  %v525_v54 = vsel %vm301_vm4, %v878_v49, -inf }
 0x2a6   : > { %v879_v51 = vpop.f32.mrb[10].mxu0  ;;  %v523_v57 = vsel %vm301_vm4, %v492_v50, -inf }
 0x2a7   : > { %v495_v52 = vpop.f32.mrb[11].mxu0  ;;  %v526_v38 = vsel %vm301_vm4, %v879_v51, -inf }
 0x2a8   : > { %v524_v0 = vsel %vm301_vm4, %v495_v52, -inf }
 0x2ac   : > { %v882_v53 = vpop.f32.mrb[12].mxu0 }
 0x2ad   : > { %v531_v55 = vsel %vm301_vm4, %v882_v53, -inf  ;;  %v508_v56 = vpop.f32.mrb[13].mxu0 }
 0x2ae   : > { %v532_v58 = vmax.f32 %v525_v54, %v531_v55  ;;  %v527_v59 = vsel %vm301_vm4, %v508_v56, -inf  ;;  %v883_v60 = vpop.f32.mrb[14].mxu0 }
 0x2af   : > { %v528_v61 = vmax.f32 %v523_v57, %v527_v59  ;;  %v533_v62 = vsel %vm301_vm4, %v883_v60, -inf  ;;  %v511_v63 = vpop.f32.mrb[15].mxu0  ;;  %v595_v59 = vpop.permute.xlu0 %594 }
 0x2b0   : > { %v534_v1 = vmax.f32 %v526_v38, %v533_v62  ;;  %v529_v2 = vsel %vm301_vm4, %v511_v63, -inf }
 0x2b1   : > { %v530_v3 = vmax.f32 %v524_v0, %v529_v2 }
 0x2b2   : > { %v536_v4 = vmax.f32 %v532_v58, %v534_v1 }
 0x2b3   : > { %v535_v5 = vmax.f32 %v528_v61, %v530_v3 }
 0x2b5   : > { %v537_v6 = vmax.f32 %v535_v5, %v536_v4 }
 0x2b7   : > { %v538_v7 = vrot.slane %v537_v6, 4 }
 0x2b9   : > { %v539_v8 = vmax.f32 %v537_v6, %v538_v7 }
 0x2bb   : > { %v540_v9 = vrot.slane %v539_v8, 2 }
 0x2bd   : > { %v541_v10 = vmax.f32 %v539_v8, %v540_v9 }
 0x2bf   : > { %v542_v11 = vrot.slane %v541_v10, 1 }
 0x2c1   : > { %v543_v12 = vmax.f32 %v541_v10, %v542_v11 }
 0x2c3   : > { %v544_v13 = vsub.f32 %v492_v50, %v543_v12  ;;  %v545_v14 = vsub.f32 %v495_v52, %v543_v12  ;;  %v546_v15 = vsub.f32 %v878_v49, %v543_v12  ;;  %v547_v16 = vsub.f32 %v879_v51, %v543_v12 }
 0x2c4   : > { %v548_v17 = vsub.f32 %v508_v56, %v543_v12  ;;  %v549_v18 = vsub.f32 %v511_v63, %v543_v12  ;;  %v550_v19 = vsub.f32 %v882_v53, %v543_v12  ;;  %v551_v20 = vsub.f32 %v883_v60, %v543_v12 }
 0x2c5   : > { %v552_v21 = vmul.f32 1.442695, %v544_v13  ;;  %v554_v22 = vmul.f32 1.442695, %v545_v14  ;;  %v556_v23 = vmul.f32 1.442695, %v546_v15 }
 0x2c6   : > { %v558_v24 = vmul.f32 1.442695, %v547_v16  ;;  %v560_v25 = vmul.f32 1.442695, %v548_v17  ;;  %v562_v26 = vmul.f32 1.442695, %v549_v18 }
 0x2c7   : > { %950 = vpow2.f32 %v552_v21  ;;  %v564_v27 = vmul.f32 1.442695, %v550_v19  ;;  %v566_v28 = vmul.f32 1.442695, %v551_v20  ;;  %v362_v60 = vrot.slane %v1119_v48, 4 }
 0x2c8   : > { %952 = vpow2.f32 %v554_v22 }
 0x2c9   : > { %954 = vpow2.f32 %v556_v23  ;;  %v363_v38 = vadd.f32 %v362_v60, %v1119_v48  ;;  %v1009_v23 = vmov (%p191_p0), 0  }
 0x2ca   : > { %956 = vpow2.f32 %v558_v24  ;;  %971 = vset.pattern.permute.xlu1 (%p191_p0), %v1009_v23  ;;  %970 = vset.pattern.permute.xlu0 (%p191_p0), %v1009_v23 }
 0x2cb   : > { %958 = vpow2.f32 %v560_v25  ;;  %v364_v61 = vrot.slane %v363_v38, 2  ;;  %v972_v25 = vld [vmem:[%s1188_s2] sm:$0xff] (%p191_p0)  }
 0x2cc   : > { %960 = vpow2.f32 %v562_v26  ;;  %v659_v26 = vld [vmem:[%s1189_s3 + $0x10] sm:$0xff] (%p191_p0)  ;;  %900 = vmatprep.mubr.msk.bf16.mxu0 (%p191_p0), %vm77_vm0, %v972_v25 }
 0x2cd   : > { %962 = vpow2.f32 %v564_v27  ;;  %v365_v62 = vadd.f32 %v364_v61, %v363_v38  ;;  %v657_v27 = vld [vmem:[%s1189_s3] sm:$0xff] (%p191_p0)  ;;  %673 = vperm.xlu1 (%p191_p0), %971, %v659_v26  }
 0x2ce   : > { %964 = vpow2.f32 %v566_v28  ;;  %v660_v28 = vld [vmem:[%s1189_s3 + $0x18] sm:$0xff] (%p191_p0) }
 0x2cf   : > { %v366_v63 = vrot.slane %v365_v62, 1 }
 0x2d1   : > { %v951_v29 = vpop.eup %950  ;;  %v367_v0 = vadd.f32 %v366_v63, %v365_v62  ;;  %678 = vperm.xlu1 (%p191_p0), %971, %v660_v28  }
 0x2d2   : > { %v953_v30 = vpop.eup %952  ;;  %v568_v31 = vsel %vm301_vm4, %v951_v29, 0.0 }
 0x2d3   : > { %v955_v32 = vpop.eup %954  ;;  %v569_v33 = vsel %vm301_vm4, %v953_v30, 0.0  ;;  %v589_v34 = vpack.c.bf16 %v953_v30, %v951_v29  ;;  %966 = vrcp.f32 %v367_v0  ;;  %v973_v29 = vld [vmem:[%s1188_s2 + $0x8] sm:$0xff] (%p191_p0)   ;;  %s974_s2 = scalar_lea.vmem (%p191_p0), %s756_s22, 512 }
 0x2d4   : > { %v957_v35 = vpop.eup %956  ;;  %v570_v37 = vadd.f32 %v569_v33, %v568_v31  ;;  %v571_v40 = vsel %vm301_vm4, %v955_v32, 0.0  ;;  %v658_v30 = vld [vmem:[%s1189_s3 + $0x8] sm:$0xff] (%p191_p0)  ;;  %p975_p1 = scmp.ne.s32.totalorder (%p191_p0), %s756_s22, %s974_s2  ;;  %p980_p3 = scmp.lt.s32.totalorder (%p191_p0), %s974_s2, %s974_s2 }
 0x2d5   : > { %v959_v39 = vpop.eup %958  ;;  %885 = vmatpush3.bf16.msra.mxu1 %v589_v34  ;;  %v590_v41 = vpack.c.bf16 %v957_v35, %v955_v32  ;;  %v573_v45 = vsel %vm301_vm4, %v957_v35, 0.0 }
 0x2d6   : > { %v961_v42 = vpop.eup %960  ;;  %v572_v43 = vadd.f32 %v571_v40, %v570_v37  ;;  %886 = vmatprep.subr.bf16.mxu1 %v1007_v36  ;;  %v575_v50 = vsel %vm301_vm4, %v959_v39, 0.0  ;;  %p981_p4 = por (%p191_p0), %p980_p3, %p979_p2 }
 0x2d7   : > { %v963_v44 = vpop.eup %962  ;;  %v591_v46 = vpack.c.bf16 %v961_v42, %v959_v39  ;;  %v577_v53 = vsel %vm301_vm4, %v961_v42, 0.0 }
 0x2d8   : > { %v965_v47 = vpop.eup %964  ;;  %v574_v49 = vadd.f32 %v573_v45, %v572_v43  ;;  %v579_v55 = vsel %vm301_vm4, %v963_v44, 0.0  ;;  %p982_p5 = pnand (%p191_p0), %p981_p4, %p975_p1 }
 0x2d9   : > { %887 = vmatpush3.bf16.msra.mxu1 %v590_v41  ;;  %v592_v51 = vpack.c.bf16 %v965_v47, %v963_v44  ;;  %v581_v57 = vsel %vm301_vm4, %v965_v47, 0.0 }
 0x2da   : > { %v576_v52 = vadd.f32 %v575_v50, %v574_v49  ;;  %888 = vmatprep.subr.bf16.mxu1 %v1007_v36 }
 0x2dc   : > { %v578_v54 = vadd.f32 %v577_v53, %v576_v52 }
 0x2dd   : > { %889 = vmatpush3.bf16.msra.mxu1 %v591_v46  ;;  %v967_v1 = vpop.eup %966 }
 0x2de   : > { %v580_v56 = vadd.f32 %v579_v55, %v578_v54  ;;  %890 = vmatprep.subr.bf16.mxu1 %v1007_v36 }
 0x2e0   : > { %v582_v58 = vadd.f32 %v581_v57, %v580_v56 }
 0x2e1   : > { %891 = vmatpush3.bf16.msra.mxu1 %v592_v51 }
 0x2e2   : > { %v583_v6 = vrot.slane %v582_v58, 4 }
 0x2e4   : > { %893 = vmatmul.mubr.msk.bf16.vlgmr.msra.gmra.mrb[4].mxu1 %vm301_vm4, %v595_v59  ;;  %v584_v7 = vadd.f32 %v583_v6, %v582_v58 }
 0x2e6   : > { %v585_v8 = vrot.slane %v584_v7, 2 }
 0x2e8   : > { %v586_v9 = vadd.f32 %v585_v8, %v584_v7 }
 0x2ea   : > { %v587_v48 = vrot.slane %v586_v9, 1 }
 0x2ec   : > { %v588_v10 = vadd.f32 %v587_v48, %v586_v9 }
 0x2ee   : > { %968 = vrcp.f32 %v588_v10 }
 0x2f8   : > { %v969_v11 = vpop.eup %968 }
 0x345   : > { %v409_v2 = vpop.f32.mrb[0].mxu1 }
 0x346   : > { %v416_v36 = vmul.f32 %v967_v1, %v409_v2  ;;  %v872_v3 = vpop.f32.mrb[1].mxu1 }
 0x347   : > { %v412_v4 = vpop.f32.mrb[2].mxu1 }
 0x348   : > { %419 = vst.msk [vmem:[%s418_s8] sm:$0xff] %vm301_vm4, %v416_v36  ;;  %v873_v5 = vpop.f32.mrb[3].mxu1 }
 0x34c   :  { %v674_v31 = vpop.permute.xlu1 (%p191_p0), %673 }
 0x350   :  { %v679_v37 = vpop.permute.xlu1 (%p191_p0), %678 }
 0x3b7   : > { %v633_v12 = vpop.f32.mrb[4].mxu1 }
 0x3b8   : > { %v640_v13 = vmul.f32 %v969_v11, %v633_v12  ;;  %v894_v14 = vpop.f32.mrb[5].mxu1 }
 0x3b9   : > { %v636_v15 = vpop.f32.mrb[6].mxu1 }
 0x3ba   : > { %642 = vrot.lane.b32.xlu0 %v640_v13, %s1006_s6  ;;  %v895_v16 = vpop.f32.mrb[7].mxu1 }
 0x3be   :  { %663 = vperm.xlu0 (%p191_p0), %970, %v657_v27  }
 0x3c2   :  { %668 = vperm.xlu0 (%p191_p0), %970, %v658_v30  }
 0x427   :  { %193 = sbr.rel (!%p191_p0) target bundleno = 234 (0xea), region = 45 }
 0x42c   : > { %v643_v17 = vpop.permute.xlu0 %642 }
 0x42d   : > { %646 = vst.msk [vmem:[%s418_s8] sm:$0xff] %vm645_vm5, %v643_v17 }
 0x434   :  { %v647_v18 = vld [vmem:[#allocation3] sm:$0xff]  ;;  %v648_v19 = vld [vmem:[#allocation3 + $0x8] sm:$0xff]  ;;  %v649_v20 = vld [vmem:[#allocation3 + $0x10] sm:$0xff] }
 0x435   :  { %v651_v21 = vpack.c.bf16 %v648_v19, %v647_v18  ;;  %v650_v22 = vld [vmem:[#allocation3 + $0x18] sm:$0xff] }
 0x436   :  { %v652_v24 = vpack.c.bf16 %v650_v22, %v649_v20 }
 0x437   :  { %896 = vmatprep.subr.bf16.mxu0 %v651_v21 }
 0x438   :  { %897 = vmatpush3.bf16.msra.mxu0 %v651_v21 }
 0x439   :  { %898 = vmatprep.subr.bf16.mxu0 %v652_v24 }
 0x43c   :  { %899 = vmatpush3.bf16.msra.mxu0 %v652_v24 }
 0x43d   :  { %v664_v32 = vpop.permute.xlu0 %663 }
 0x43f   :  { %901 = vmatmul.mubr.msk.bf16.vlgmr.msra.gmra.mrb[0].mxu0 %vm77_vm0, %v973_v29 }
 0x441   :  { %v669_v41 = vpop.permute.xlu0 %668 }
 0x512   :  { %v902_v33 = vpop.f32.mrb[0].mxu0 }
 0x513   :  { %v740_v34 = vadd.f32 %v902_v33, %v674_v31  ;;  %v731_v35 = vpop.f32.mrb[1].mxu0 }
 0x514   :  { %v732_v39 = vadd.f32 %v731_v35, %v664_v32  ;;  %v903_v40 = vpop.f32.mrb[2].mxu0 }
 0x515   :  { %748 = vst [vmem:[#allocation4 + $0x10] sm:$0xff] %v740_v34  ;;  %v743_v42 = vadd.f32 %v903_v40, %v679_v37  ;;  %v734_v43 = vpop.f32.mrb[3].mxu0 }
 0x516   :  { %746 = vst [vmem:[#allocation4] sm:$0xff] %v732_v39  ;;  %v735_v44 = vadd.f32 %v734_v43, %v669_v41 }
 0x517   :  { %749 = vst [vmem:[#allocation4 + $0x18] sm:$0xff] %v743_v42 }
 0x518   :  { %747 = vst [vmem:[#allocation4 + $0x8] sm:$0xff] %v735_v44 }
 0x519   :  { %985 = shalt.err (!%p982_p5)
}
 0x51a   :  { %s986_s0 = scalar_lea.hbm %s1190_s4, 512 }
 0x51b   :  { %p987_p6 = scmp.ne.s32.totalorder %s1190_s4, %s986_s0  ;;  %p990_p7 = scmp.lt.u32.totalorder %s986_s0, %s1190_s4 }
 0x51d   :  { %p992_p8 = pnand %p990_p7, %p987_p6 }
 0x51f   :  { %995 = shalt.err (!%p992_p8)
}
 0x520   :  { %s1011_s28 = smov 128   ;;  %s1012_s29 = smov 8  }
 0x521   :  { %761 = dma.vmem_to_hbm [thread:$0]  %s756_s22, 512, %s1190_s4, [#allocation5], %s1011_s28, %s1011_s28, %s1012_s29  }
 0x522   :  { %1000 = dma.done.wait [#allocation5], 512  }
 0x523   :  { %1001 = vsyncadd [#allocation5], 4294966784 }
 0x524   :  { %765 = vsyncpa [#allocation5], 1 }

</bundles_post_ra>
